<compile_context>
chip_gen: v7x
topology: tpu7x:2x2x1
jax: 0.10.0
libtpu: 0.0.40
codegen_flags: <defaults>
</compile_context>

<pallas_src>
import math

import jax
import jax.numpy as jnp
from jax.experimental import pallas as pl
from jax.experimental.pallas import tpu as pltpu


_LANES = 128
_DEFAULT_TARGET_BLOCK_BYTES = 2 * 1024 * 1024   # per-operand block byte target
_DEFAULT_MIN_PALLAS_BYTES = 1 * 1024 * 1024     # below this, plain XLA is faster
_MAX_FUSED_FOOTPRINT = 40 * 1024 * 1024         # cap on double-buffered VMEM use

_FLOAT_KEEP = (jnp.dtype(jnp.float32), jnp.dtype(jnp.bfloat16), jnp.dtype(jnp.float16))


def _sublane_quantum(dtype) -> int:
    # Packed sub-32-bit dtypes need taller sublane tiles: (8,128)/(16,128)/(32,128).
    return {4: 8, 2: 16, 1: 32}.get(jnp.dtype(dtype).itemsize, 8)


def _out_dtype(dtype):
    dt = jnp.dtype(dtype)
    return dt if dt in _FLOAT_KEEP else jnp.dtype(jnp.float32)


def _canonicalize_input(x):
    x = jnp.asarray(x)
    dt = jnp.dtype(x.dtype)
    if dt in _FLOAT_KEEP:
        return x
    if jnp.issubdtype(dt, jnp.integer) and dt.itemsize <= 4:
        return x  # int -> float cast happens inside the kernel (no extra HBM pass)
    # TODO(synk): float64 / int64 / bool / complex are not TPU-kernel friendly;
    # cast to float32 up front (rare for this eval path).
    return x.astype(jnp.float32)


def _norm_xla(x, out_dtype):
    # Fused XLA elementwise op: one HBM read + one write (roofline for this op).
    return jnp.clip(x.astype(out_dtype) * 0.5 + 0.5, 0.0, 1.0).astype(out_dtype)


def _vmem_limit(footprint_bytes):
    # Explicit scoped-VMEM budget: covers v5e's 16 MiB default scoped limit and
    # stays well under v7x's 64 MiB physical VMEM.
    return int(min(48 * 1024 * 1024, max(32 * 1024 * 1024, footprint_bytes * 5 // 4)))


# ----------------------------- Pallas kernel ------------------------------ #

def _norm_kernel(*refs):
    """Variadic elementwise norm: first half of refs are inputs, second half outputs.

    The (possible) int->float cast happens here, in VMEM, so integer inputs are
    read from HBM exactly once in their native dtype.
    """
    n = len(refs) // 2
    for x_ref, o_ref in zip(refs[:n], refs[n:]):
        x = x_ref[...].astype(o_ref.dtype)
        o_ref[...] = jnp.clip(x * 0.5 + 0.5, 0.0, 1.0)


def _norm_slabs(slabs, out_dtypes, tile_rows):
    """Run the norm kernel on N equally-shaped (rows, width) slabs in ONE pallas_call."""
    rows, width = slabs[0].shape
    grid = (pl.cdiv(rows, tile_rows),)  # last block may be partial
    block = pl.BlockSpec((tile_rows, width), lambda i: (i, 0))
    block_bytes = tile_rows * width * (
        sum(s.dtype.itemsize for s in slabs)
        + sum(jnp.dtype(d).itemsize for d in out_dtypes))
    outs = pl.pallas_call(
        _norm_kernel,
        out_shape=tuple(jax.ShapeDtypeStruct((rows, width), d) for d in out_dtypes),
        grid_spec=pltpu.PrefetchScalarGridSpec(
            num_scalar_prefetch=0,
            grid=grid,
            in_specs=[block] * len(slabs),
            out_specs=tuple(block for _ in slabs),
        ),
        compiler_params=pltpu.CompilerParams(
            dimension_semantics=("parallel",),
            vmem_limit_bytes=_vmem_limit(2 * block_bytes),  # double-buffered
        ),
    )(*slabs)
    return outs if isinstance(outs, (list, tuple)) else (outs,)


# ------------------------- slab / tile planning ---------------------------- #

def _round_up(x, m):
    return ((x + m - 1) // m) * m


def _pick_width(n, quantum, max_width=4096):
    """Widest lane-dense last dim (multiple of 128) that keeps rows a multiple of quantum."""
    width = _LANES
    while width * 2 <= max_width and n % (quantum * width * 2) == 0:
        width *= 2
    return width


def _pick_tile_rows(rows, quantum, target_rows):
    """Row tile near the byte target (multiple of quantum). No divisor constraint:
    the grid uses cdiv so the last block may be partial."""
    tile = max(quantum, (min(target_rows, rows) // quantum) * quantum)
    tile = min(tile, _round_up(rows, quantum))
    steps = pl.cdiv(rows, tile)
    # Prefer an even number of grid steps so the "parallel" axis splits evenly
    # across v7x's two TensorCores (no effect on single-TC v5e/v6e).
    if steps % 2 == 1 and rows > quantum:
        cand = max(quantum, _round_up(pl.cdiv(rows, steps + 1), quantum))
        if pl.cdiv(rows, cand) % 2 == 0:
            tile = cand
    return tile


# ----------------------------- public wrappers ------------------------------ #

def _norm_single(x, out_dtype, target_block_bytes, min_pallas_bytes):
    n = int(x.size)
    out_item = jnp.dtype(out_dtype).itemsize
    if n == 0 or n * out_item < min_pallas_bytes:
        return _norm_xla(x, out_dtype)
    quantum = max(_sublane_quantum(x.dtype), _sublane_quantum(out_dtype))
    if n % (quantum * _LANES) != 0:
        # TODO(synk): handle the ragged tail in-kernel with a masked store. The
        # fused XLA clip is already one HBM read + one write (roofline), whereas
        # pad + kernel + slice would triple traffic; ragged sizes are rare for
        # image tensors so this keeps the common case optimal and simple.
        return _norm_xla(x, out_dtype)
    max_item = max(x.dtype.itemsize, out_item)
    width = _pick_width(n, quantum)
    rows = n // width
    target_rows = max(1, target_block_bytes // (width * max_item))
    tile_rows = _pick_tile_rows(rows, quantum, target_rows)
    (out,) = _norm_slabs((x.reshape(rows, width),), (out_dtype,), tile_rows)
    return out.reshape(x.shape)


def norm_fused(*xs,
               target_block_bytes=_DEFAULT_TARGET_BLOCK_BYTES,
               min_pallas_bytes=_DEFAULT_MIN_PALLAS_BYTES):
    """(x*0.5+0.5).clip(0,1) on several arrays, fused into one pallas_call when
    they share element count (amortizes launch/pipeline overhead)."""
    if not xs:
        return ()
    xs = tuple(_canonicalize_input(x) for x in xs)
    out_dtypes = tuple(_out_dtype(x.dtype) for x in xs)

    total_bytes = sum(int(x.size) * jnp.dtype(od).itemsize for x, od in zip(xs, out_dtypes))
    if total_bytes < min_pallas_bytes:
        # Small-size bypass: Pallas launch + pipeline prologue costs several us;
        # the fused XLA elementwise op is strictly faster for tiny tensors.
        return tuple(_norm_xla(x, od) for x, od in zip(xs, out_dtypes))

    n = int(xs[0].size)
    quantum = max(max(_sublane_quantum(x.dtype) for x in xs),
                  max(_sublane_quantum(od) for od in out_dtypes))
    same = all(int(x.size) == n for x in xs)

    if same and n > 0 and n % (quantum * _LANES) == 0:
        max_item = max(max(x.dtype.itemsize for x in xs),
                       max(jnp.dtype(od).itemsize for od in out_dtypes))
        # Keep ~target bytes per operand (do NOT shrink by fan-in), but cap the
        # total double-buffered VMEM footprint for pathological fusion counts.
        per_op_target = min(target_block_bytes,
                            max(256 * 1024, _MAX_FUSED_FOOTPRINT // (4 * len(xs))))
        width = _pick_width(n, quantum)
        rows = n // width
        target_rows = max(1, per_op_target // (width * max_item))
        tile_rows = _pick_tile_rows(rows, quantum, target_rows)
        slabs = tuple(x.reshape(rows, width) for x in xs)
        outs = _norm_slabs(slabs, out_dtypes, tile_rows)
        return tuple(o.reshape(x.shape) for o, x in zip(outs, xs))

    # Fallback: mixed sizes / ragged element counts -> handle independently.
    return tuple(_norm_single(x, od, target_block_bytes, min_pallas_bytes)
                 for x, od in zip(xs, out_dtypes))


def norm_pallas(x, *,
                target_block_bytes=_DEFAULT_TARGET_BLOCK_BYTES,
                min_pallas_bytes=_DEFAULT_MIN_PALLAS_BYTES):
    """Single-array elementwise norm via the Pallas TPU kernel (XLA for tiny inputs)."""
    (out,) = norm_fused(x, target_block_bytes=target_block_bytes,
                        min_pallas_bytes=min_pallas_bytes)
    return out


def eval_norm(gt, measurement, sample, start=None, end=None, *,
              min_pallas_bytes=_DEFAULT_MIN_PALLAS_BYTES,
              max_block_bytes=4 * 1024 * 1024):
    """norm(gt[start:end]), norm(measurement[start:end]), norm(sample) fused into one
    pallas_call. The batch offset is folded into the gt/measurement index_maps so the
    slices are never materialized in HBM (saves a full read+write per sliced operand)."""
    gt = _canonicalize_input(gt)
    measurement = _canonicalize_input(measurement)
    sample = _canonicalize_input(sample)

    batch = int(gt.shape[0]) if gt.ndim >= 1 else 0
    s, e, _ = slice(start, end).indices(batch)
    nb = max(0, e - s)

    inner = tuple(int(d) for d in gt.shape[1:])
    inner_elems = math.prod(inner) if inner else 1
    out_dts = tuple(_out_dtype(a.dtype) for a in (gt, measurement, sample))
    in_items = [a.dtype.itemsize for a in (gt, measurement, sample)]
    out_items = [jnp.dtype(d).itemsize for d in out_dts]
    total_out_bytes = nb * inner_elems * sum(out_items)

    use_pallas = (
        nb > 0
        and gt.ndim >= 3                                   # last two block dims = full dims
        and tuple(measurement.shape) == tuple(gt.shape)
        and tuple(sample.shape) == (nb,) + inner
        and inner_elems * max(in_items + out_items) <= max_block_bytes
        and total_out_bytes >= min_pallas_bytes
    )
    if not use_pallas:
        # Fallback: materialize the slices and use the flat-slab path / XLA bypass.
        return norm_fused(gt[s:e], measurement[s:e], sample,
                          min_pallas_bytes=min_pallas_bytes)

    zeros = (0,) * len(inner)
    blk = (1,) + inner

    def off_map(i, _s=s, _z=zeros):   # batch offset folded into the index_map
        return (i + _s,) + _z

    def id_map(i, _z=zeros):
        return (i,) + _z

    in_specs = [pl.BlockSpec(blk, off_map),
                pl.BlockSpec(blk, off_map),
                pl.BlockSpec(blk, id_map)]
    out_specs = tuple(pl.BlockSpec(blk, id_map) for _ in range(3))
    out_shape = tuple(jax.ShapeDtypeStruct((nb,) + inner, d) for d in out_dts)

    block_bytes = inner_elems * (sum(in_items) + sum(out_items))
    outs = pl.pallas_call(
        _norm_kernel,
        out_shape=out_shape,
        grid_spec=pltpu.PrefetchScalarGridSpec(
            num_scalar_prefetch=0,
            grid=(nb,),
            in_specs=in_specs,
            out_specs=out_specs,
        ),
        compiler_params=pltpu.CompilerParams(
            dimension_semantics=("parallel",),
            vmem_limit_bytes=_vmem_limit(2 * block_bytes),
        ),
    )(gt, measurement, sample)
    return tuple(outs)


# ----------------------------- EvalFn wrapper ------------------------------ #

class EvalFn:
    """JAX/Pallas port of the PyTorch EvalFn module."""

    def __init__(self, gt, measurement):
        self.gt = jnp.asarray(gt)
        self.measurement = jnp.asarray(measurement)
        self.start = None
        self.end = None

    def norm(self, x):
        return norm_pallas(x)

    def set_batch_index(self, start, end):
        self.start = start
        self.end = end

    def forward(self, sample):
        # Mirrors the reference: slice gt/measurement and dispatch to evaluate().
        return self.evaluate(self.gt[self.start:self.end],
                             self.measurement[self.start:self.end],
                             sample)

    def evaluate(self, gt, measurement, sample):
        # TODO(synk): `evaluate` is abstract (`pass`) in the reference module;
        # subclasses define the metric. Returning None matches the reference.
        return None

    def norm_batch(self, sample, **kwargs):
        """Fused Pallas norm of (gt[start:end], measurement[start:end], sample)
        without materializing the batch slices in HBM."""
        return eval_norm(self.gt, self.measurement, sample, self.start, self.end, **kwargs)

    __call__ = forward


# --------------------------------- demo ----------------------------------- #

if __name__ == "__main__":
    key = jax.random.PRNGKey(0)
    k1, k2, k3 = jax.random.split(key, 3)

    # Small NCHW shapes: batch=4, channels=4, spatial=16x16; sample batch=2.
    gt = jax.random.normal(k1, (4, 4, 16, 16), dtype=jnp.float32)
    measurement = jax.random.normal(k2, (4, 4, 16, 16), dtype=jnp.float32)
    sample = jax.random.normal(k3, (2, 4, 16, 16), dtype=jnp.float32)

    fn = EvalFn(gt, measurement)
    fn.set_batch_index(0, 2)

    # forward() returns None (evaluate is abstract), matching PyTorch.
    assert fn(sample) is None

    def ref_norm(t):
        return jnp.clip(t.astype(jnp.float32) * 0.5 + 0.5, 0.0, 1.0)

    # Fused eval-path Pallas kernel: batch offset folded into the index_map,
    # forced onto the Pallas path despite the tiny demo size.
    normed_gt, normed_meas, normed_sample = fn.norm_batch(sample, min_pallas_bytes=0)
    jax.block_until_ready((normed_gt, normed_meas, normed_sample))
    assert normed_gt.shape == (2, 4, 16, 16)
    assert normed_sample.shape == sample.shape
    assert jnp.allclose(normed_gt, ref_norm(gt[0:2]), atol=1e-6), "norm mismatch (gt)"
    assert jnp.allclose(normed_meas, ref_norm(measurement[0:2]), atol=1e-6), "norm mismatch (meas)"
    assert jnp.allclose(normed_sample, ref_norm(sample), atol=1e-6), "norm mismatch (sample)"

    # Flat-slab Pallas path (float32) and in-kernel int32->float32 cast path.
    s_pal = norm_pallas(sample, min_pallas_bytes=0)
    xi = jnp.arange(-512, 512, dtype=jnp.int32).reshape(8, 128)
    i_pal = norm_pallas(xi, min_pallas_bytes=0)
    jax.block_until_ready((s_pal, i_pal))
    assert jnp.allclose(s_pal, ref_norm(sample), atol=1e-6)
    assert i_pal.dtype == jnp.float32
    assert jnp.allclose(i_pal, ref_norm(xi), atol=1e-6)

    # Small-size XLA bypass (default threshold) still matches.
    s_xla = fn.norm(sample)
    jax.block_until_ready(s_xla)
    assert jnp.allclose(s_xla, ref_norm(sample), atol=1e-6)

    print("KERNEL_OK")
</pallas_src>

<mosaic_0001>
module attributes {stable_mosaic.version = 11 : i64} {
  func.func @_norm_kernel(%arg0: i32, %arg1: memref<1x4x16x16xf32, #tpu.memory_space<vmem>>, %arg2: memref<1x4x16x16xf32, #tpu.memory_space<vmem>>, %arg3: memref<1x4x16x16xf32, #tpu.memory_space<vmem>>, %arg4: memref<1x4x16x16xf32, #tpu.memory_space<vmem>>, %arg5: memref<1x4x16x16xf32, #tpu.memory_space<vmem>>, %arg6: memref<1x4x16x16xf32, #tpu.memory_space<vmem>>) attributes {dimension_semantics = [#tpu.dimension_semantics<parallel>], iteration_bounds = array<i64: 2>, scalar_prefetch = 0 : i64, scratch_operands = 0 : i64, tpu.core_type = #tpu.core_type<tc>, window_params = [{transform_indices = @transform_0, window_bounds = array<i64: 1, 4, 16, 16>}, {transform_indices = @transform_1, window_bounds = array<i64: 1, 4, 16, 16>}, {transform_indices = @transform_2, window_bounds = array<i64: 1, 4, 16, 16>}, {transform_indices = @transform_3, window_bounds = array<i64: 1, 4, 16, 16>}, {transform_indices = @transform_4, window_bounds = array<i64: 1, 4, 16, 16>}, {transform_indices = @transform_5, window_bounds = array<i64: 1, 4, 16, 16>}]} {
    %c0 = arith.constant 0 : index
    %c0_0 = arith.constant 0 : index
    %c0_1 = arith.constant 0 : index
    %c0_2 = arith.constant 0 : index
    %0 = vector.load %arg1[%c0, %c0_0, %c0_1, %c0_2] : memref<1x4x16x16xf32, #tpu.memory_space<vmem>>, vector<1x4x16x16xf32>
    %cst = arith.constant 5.000000e-01 : f32
    %1 = vector.broadcast %cst : f32 to vector<1x4x16x16xf32>
    %2 = arith.mulf %0, %1 : vector<1x4x16x16xf32>
    %cst_3 = arith.constant 5.000000e-01 : f32
    %3 = vector.broadcast %cst_3 : f32 to vector<1x4x16x16xf32>
    %4 = arith.addf %2, %3 : vector<1x4x16x16xf32>
    %cst_4 = arith.constant 0.000000e+00 : f32
    %cst_5 = arith.constant 1.000000e+00 : f32
    %5 = vector.broadcast %cst_4 : f32 to vector<1x4x16x16xf32>
    %6 = arith.maximumf %5, %4 : vector<1x4x16x16xf32>
    %7 = vector.broadcast %cst_5 : f32 to vector<1x4x16x16xf32>
    %8 = arith.minimumf %7, %6 : vector<1x4x16x16xf32>
    %c0_6 = arith.constant 0 : index
    %c0_7 = arith.constant 0 : index
    %c0_8 = arith.constant 0 : index
    %c0_9 = arith.constant 0 : index
    %9 = vector.load %arg4[%c0_6, %c0_7, %c0_8, %c0_9] : memref<1x4x16x16xf32, #tpu.memory_space<vmem>>, vector<1x4x16x16xf32>
    tpu.vector_store %arg4[%c0_6, %c0_7, %c0_8, %c0_9], %8 {strides = array<i32>} : memref<1x4x16x16xf32, #tpu.memory_space<vmem>>, vector<1x4x16x16xf32>,
    %c0_10 = arith.constant 0 : index
    %c0_11 = arith.constant 0 : index
    %c0_12 = arith.constant 0 : index
    %c0_13 = arith.constant 0 : index
    %10 = vector.load %arg2[%c0_10, %c0_11, %c0_12, %c0_13] : memref<1x4x16x16xf32, #tpu.memory_space<vmem>>, vector<1x4x16x16xf32>
    %cst_14 = arith.constant 5.000000e-01 : f32
    %11 = vector.broadcast %cst_14 : f32 to vector<1x4x16x16xf32>
    %12 = arith.mulf %10, %11 : vector<1x4x16x16xf32>
    %cst_15 = arith.constant 5.000000e-01 : f32
    %13 = vector.broadcast %cst_15 : f32 to vector<1x4x16x16xf32>
    %14 = arith.addf %12, %13 : vector<1x4x16x16xf32>
    %cst_16 = arith.constant 0.000000e+00 : f32
    %cst_17 = arith.constant 1.000000e+00 : f32
    %15 = vector.broadcast %cst_16 : f32 to vector<1x4x16x16xf32>
    %16 = arith.maximumf %15, %14 : vector<1x4x16x16xf32>
    %17 = vector.broadcast %cst_17 : f32 to vector<1x4x16x16xf32>
    %18 = arith.minimumf %17, %16 : vector<1x4x16x16xf32>
    %c0_18 = arith.constant 0 : index
    %c0_19 = arith.constant 0 : index
    %c0_20 = arith.constant 0 : index
    %c0_21 = arith.constant 0 : index
    %19 = vector.load %arg5[%c0_18, %c0_19, %c0_20, %c0_21] : memref<1x4x16x16xf32, #tpu.memory_space<vmem>>, vector<1x4x16x16xf32>
    tpu.vector_store %arg5[%c0_18, %c0_19, %c0_20, %c0_21], %18 {strides = array<i32>} : memref<1x4x16x16xf32, #tpu.memory_space<vmem>>, vector<1x4x16x16xf32>,
    %c0_22 = arith.constant 0 : index
    %c0_23 = arith.constant 0 : index
    %c0_24 = arith.constant 0 : index
    %c0_25 = arith.constant 0 : index
    %20 = vector.load %arg3[%c0_22, %c0_23, %c0_24, %c0_25] : memref<1x4x16x16xf32, #tpu.memory_space<vmem>>, vector<1x4x16x16xf32>
    %cst_26 = arith.constant 5.000000e-01 : f32
    %21 = vector.broadcast %cst_26 : f32 to vector<1x4x16x16xf32>
    %22 = arith.mulf %20, %21 : vector<1x4x16x16xf32>
    %cst_27 = arith.constant 5.000000e-01 : f32
    %23 = vector.broadcast %cst_27 : f32 to vector<1x4x16x16xf32>
    %24 = arith.addf %22, %23 : vector<1x4x16x16xf32>
    %cst_28 = arith.constant 0.000000e+00 : f32
    %cst_29 = arith.constant 1.000000e+00 : f32
    %25 = vector.broadcast %cst_28 : f32 to vector<1x4x16x16xf32>
    %26 = arith.maximumf %25, %24 : vector<1x4x16x16xf32>
    %27 = vector.broadcast %cst_29 : f32 to vector<1x4x16x16xf32>
    %28 = arith.minimumf %27, %26 : vector<1x4x16x16xf32>
    %c0_30 = arith.constant 0 : index
    %c0_31 = arith.constant 0 : index
    %c0_32 = arith.constant 0 : index
    %c0_33 = arith.constant 0 : index
    %29 = vector.load %arg6[%c0_30, %c0_31, %c0_32, %c0_33] : memref<1x4x16x16xf32, #tpu.memory_space<vmem>>, vector<1x4x16x16xf32>
    tpu.vector_store %arg6[%c0_30, %c0_31, %c0_32, %c0_33], %28 {strides = array<i32>} : memref<1x4x16x16xf32, #tpu.memory_space<vmem>>, vector<1x4x16x16xf32>,
    return
  }
  func.func @transform_0(%arg0: i32) -> (i32, i32, i32, i32) {
    %c0_i32 = arith.constant 0 : i32
    %0 = arith.addi %arg0, %c0_i32 : i32
    %c0_i32_0 = arith.constant 0 : i32
    %c0_i32_1 = arith.constant 0 : i32
    %c0_i32_2 = arith.constant 0 : i32
    %c0_i32_3 = arith.constant 0 : i32
    return %0, %c0_i32_0, %c0_i32_1, %c0_i32_2 : i32, i32, i32, i32
  }
  func.func @transform_1(%arg0: i32) -> (i32, i32, i32, i32) {
    %c0_i32 = arith.constant 0 : i32
    %0 = arith.addi %arg0, %c0_i32 : i32
    %c0_i32_0 = arith.constant 0 : i32
    %c0_i32_1 = arith.constant 0 : i32
    %c0_i32_2 = arith.constant 0 : i32
    %c0_i32_3 = arith.constant 0 : i32
    return %0, %c0_i32_0, %c0_i32_1, %c0_i32_2 : i32, i32, i32, i32
  }
  func.func @transform_2(%arg0: i32) -> (i32, i32, i32, i32) {
    %c0_i32 = arith.constant 0 : i32
    %c0_i32_0 = arith.constant 0 : i32
    %c0_i32_1 = arith.constant 0 : i32
    %c0_i32_2 = arith.constant 0 : i32
    return %arg0, %c0_i32, %c0_i32_0, %c0_i32_1 : i32, i32, i32, i32
  }
  func.func @transform_3(%arg0: i32) -> (i32, i32, i32, i32) {
    %c0_i32 = arith.constant 0 : i32
    %c0_i32_0 = arith.constant 0 : i32
    %c0_i32_1 = arith.constant 0 : i32
    %c0_i32_2 = arith.constant 0 : i32
    return %arg0, %c0_i32, %c0_i32_0, %c0_i32_1 : i32, i32, i32, i32
  }
  func.func @transform_4(%arg0: i32) -> (i32, i32, i32, i32) {
    %c0_i32 = arith.constant 0 : i32
    %c0_i32_0 = arith.constant 0 : i32
    %c0_i32_1 = arith.constant 0 : i32
    %c0_i32_2 = arith.constant 0 : i32
    return %arg0, %c0_i32, %c0_i32_0, %c0_i32_1 : i32, i32, i32, i32
  }
  func.func @transform_5(%arg0: i32) -> (i32, i32, i32, i32) {
    %c0_i32 = arith.constant 0 : i32
    %c0_i32_0 = arith.constant 0 : i32
    %c0_i32_1 = arith.constant 0 : i32
    %c0_i32_2 = arith.constant 0 : i32
    return %arg0, %c0_i32, %c0_i32_0, %c0_i32_1 : i32, i32, i32, i32
  }
}

</mosaic_0001>

<bundles_post_ra>
// kernel: tpu_custom_call.1
= control target key start
LH: loop header
LB: loop body
LE: loop exit
PB: predicated region body
PF: predicated region fallthrough
CT: control target
= control target key end

     0   :  { %s1499_s0 = inlined_call_operand.hbm [shape: f32[4,4,16,16], index: 0, kind: input, shape index: {}]   ;;  %s1500_s1 = inlined_call_operand.hbm [shape: f32[4,4,16,16], index: 1, kind: input, shape index: {}]   ;;  %s1501_s2 = inlined_call_operand.hbm [shape: f32[2,4,16,16], index: 2, kind: input, shape index: {}]   ;;  %s1502_s3 = inlined_call_operand.hbm [shape: f32[2,4,16,16], index: 3, kind: output, shape index: {0}]   ;;  %s1503_s4 = inlined_call_operand.hbm [shape: f32[2,4,16,16], index: 4, kind: output, shape index: {1}]   ;;  %s1504_s5 = inlined_call_operand.hbm [shape: f32[2,4,16,16], index: 5, kind: output, shape index: {2}]  }
   0x1   :  { %1513 = sst [smem:[#allocation17_spill]] %s1499_s0 }
   0x2   :  { %1514 = sst [smem:[#allocation18_spill]] %s1500_s1 }
   0x3   :  { %11 = vsyncpa [#allocation3], 0 }
   0x4   :  { %13 = vsyncpa [#allocation3 + $0x1], 0 }
   0x5   :  { %14 = vsyncpa [#allocation6], 0 }
   0x6   :  { %16 = vsyncpa [#allocation6 + $0x1], 0 }
   0x7   :  { %17 = vsyncpa [#allocation4], 0 }
   0x8   :  { %19 = vsyncpa [#allocation4 + $0x1], 0 }
   0x9   :  { %20 = vsyncpa [#allocation10], 0 }
   0xa   :  { %22 = vsyncpa [#allocation10 + $0x1], 0  ;;  %s1084_s18 = smov 0   ;;  %s1086_s19 = smov 0  }
   0xb   :  { %s1088_s20 = smov 0   ;;  %s1090_s21 = smov 0  }
   0xc LB: > { %s1105_s22 = sadd.s32 4294967295, %s1042_s21   ;;  %s1505_s23 = sadd.s32 4294967294, %s1042_s21   ;;  %s1042_s21 = sphi %s1090_s21, %s1538_s21   ;;  %s1038_s20 = sphi %s1088_s20, %s1537_s20   ;;  %s1034_s19 = sphi %s1086_s19, %s1536_s19   ;;  %s1030_s18 = sphi %s1084_s18, %s1535_s18  }
   0xd   : > { %s1109_s24 = sadd.s32 1, %s1042_s21   ;;  %s35_s25 = sadd.s32 1, %s1038_s20 }
   0xe   : > { %s32_s26 = ssub.s32 %s1042_s21, %s1109_s24  ;;  %p42_p0 = scmp.ne.s32.totalorder %s1038_s20, %s1034_s19 }
   0xf   : > { %p33_p1 = scmp.eq.s32.totalorder %s32_s26, 0  ;;  %p43_p2 = scmp.eq.s32.totalorder %s1042_s21, 0 }
  0x10   : > { %p48_p3 = scmp.ne.s32.totalorder %s1034_s19, %s1030_s18  ;;  %p49_p4 = scmp.eq.s32.totalorder %s1105_s22, 0 }
  0x11   : > { %s1121_s27 = scalar_select %p33_p1, %s1038_s20, %s35_s25  }
  0x12   : > { %p44_p5 = por %p43_p2, %p42_p0  ;;  %p1123_p6 = por %p49_p4, %p48_p3 }
  0x13   : > { %1515 = sst [smem:[#allocation16_spill]] %s1121_s27  ;;  %p124_p7 = scmp.eq.s32.totalorder %s1105_s22, 1 }
  0x14   : > { %s1516_s28 = scalar_select %p1123_p6, 1, 0 }
  0x15   : > { %p130_p8 = scmp.eq.s32.totalorder %s1505_s23, 1  ;;  %p784_p10 = scmp.lt.s32.totalorder %s1042_s21, 2 }
  0x16   : > { %p1132_p11 = por %p124_p7, %p42_p0  ;;  %s1508_s6 = sand.u32 1, %s1038_s20  }
  0x17   : > { %p1136_p12 = por %p130_p8, %p48_p3  ;;  %s1142_s7 = sshll.u32 %s1042_s21, 10 }
  0x18   : > { %s1517_s29 = scalar_select %p1132_p11, 1, 0 }
  0x19   : > { %s1518_s30 = scalar_select %p1136_p12, 1, 0 }
  0x1a   : > { %s1146_s8 = sshll.u32 %s1508_s6, 6  ;;  %p1148_p13 = pnand %p784_p10, %p44_p5 }
  0x1b   : > { %s223_s10 = sand.u32 1, %s1042_s21   ;;  %s1520_s1 = sld [smem:[#allocation18_spill]] }
  0x1c   : > { %s227_s14 = scalar_lea.vmem [#allocation5], %s1146_s8  ;;  %s1163_s16 = scalar_lea.sflag [#allocation6], %s223_s10 }
  0x1d   : > { %s234_s15 = sshll.u32 %s227_s14, 4  ;;  %p1169_p2 = pneg %p1148_p13  ;;  %s1160_s15 = int_to_ptr.vmem [resolvable:$true] %s234_s15 }
  0x21   : > { %s1157_s13 = scalar_lea.hbm %s1520_s1, %s1142_s7  ;;  %s827_s12 = scalar_lea.hbm %s1520_s1, 4096 }
  0x22   : > { %s822_s17 = scalar_lea.hbm %s1157_s13, 1024  ;;  %p828_p5 = scmp.lt.u32.totalorder %s1157_s13, %s1520_s1 }
  0x23   : > { %p823_p1 = scmp.ne.s32.totalorder %s1157_s13, %s822_s17  ;;  %p829_p7 = scmp.lt.u32.totalorder %s827_s12, %s822_s17 }
  0x24   : > { %p831_p10 = scmp.lt.u32.totalorder %s822_s17, %s1157_s13 }
  0x25   : > { %p825_p3 = pnand %p1169_p2, %p823_p1  ;;  %p830_p8 = por %p829_p7, %p828_p5 }
  0x27   : > { %p826_p4 = pneg %p825_p3  ;;  %p832_p9 = por %p831_p10, %p830_p8 }
  0x29   : > { %p833_p0 = pnand %p832_p9, %p826_p4 }
  0x2b   : > { %836 = shalt.err (!%p833_p0)
}
  0x2c   : > { %s837_s10 = scalar_lea.vmem %s1160_s15, 1024  ;;  %s1044_s26 = smov [#allocation5]  }
  0x2d   : > { %p838_p1 = scmp.ne.s32.totalorder %s1160_s15, %s837_s10  ;;  %s842_s11 = sshll.u32 %s1044_s26, 4  ;;  %s843_s11 = int_to_ptr.vmem [resolvable:$false] %s842_s11 }
  0x2e   : > { %s844_s23 = scalar_lea.vmem %s843_s11, 2048  ;;  %p845_p11 = scmp.lt.s32.totalorder %s1160_s15, %s843_s11 }
  0x2f   : > { %p840_p3 = pnand %p838_p1, %p1169_p2  ;;  %p846_p6 = scmp.lt.s32.totalorder %s844_s23, %s837_s10 }
  0x31   : > { %p841_p12 = pneg %p840_p3  ;;  %p847_p5 = por %p846_p6, %p845_p11 }
  0x33   : > { %p848_p7 = pnand %p847_p5, %p841_p12 }
  0x35   : > { %851 = shalt.err (!%p848_p7)
}
  0x36   : > { %s1509_s17 = smov 128   ;;  %s1511_s12 = smov 8  }
  0x37   : > { %770 = dma.hbm_to_vmem [thread:$0]  (!%p1148_p13), %s1157_s13, 1024, %s1160_s15, %s1163_s16, %s1509_s17, %s1509_s17, %s1511_s12  }
  0x38   : > { %p263_p6 = scmp.lt.s32.totalorder %s1042_s21, 3  ;;  %s1522_s0 = sld [smem:[#allocation17_spill]] }
  0x39   : > { %p1523_p9 = scmp.ge.s32.totalorder %s1042_s21, 1  ;;  %s206_s23 = scalar_lea.vmem [#allocation2], %s1146_s8 }
  0x3a   : > { %s213_s6 = sshll.u32 %s206_s23, 4  ;;  %s1525_s13 = sand.u32 1, %s1038_s20   ;;  %s1210_s6 = int_to_ptr.vmem [resolvable:$true] %s213_s6 }
  0x3b   : > { %p1205_p11 = pnand %p1523_p9, %p263_p6  ;;  %s1214_s15 = scalar_lea.sflag [#allocation3], %s1525_s13 }
  0x3d   : > { %s1524_s11 = scalar_select %p1205_p11, 1, 0 }
  0x3e   : > { %s1201_s26 = scalar_lea.hbm %s1522_s0, %s1142_s7  ;;  %s857_s12 = scalar_lea.hbm %s1522_s0, 4096 }
  0x3f   : > { %s852_s17 = scalar_lea.hbm %s1201_s26, 1024  ;;  %p858_p8 = scmp.lt.u32.totalorder %s1201_s26, %s1522_s0 }
  0x40   : > { %p853_p12 = scmp.ne.s32.totalorder %s1201_s26, %s852_s17  ;;  %p859_p10 = scmp.lt.u32.totalorder %s857_s12, %s852_s17 }
  0x41   : > { %p861_p3 = scmp.lt.u32.totalorder %s852_s17, %s1201_s26 }
  0x42   : > { %p855_p0 = pnand %p853_p12, %p1169_p2  ;;  %p860_p1 = por %p859_p10, %p858_p8 }
  0x44   : > { %p856_p4 = pneg %p855_p0  ;;  %p862_p5 = por %p861_p3, %p860_p1 }
  0x46   : > { %p863_p7 = pnand %p862_p5, %p856_p4 }
  0x48   : > { %866 = shalt.err (!%p863_p7)
}
  0x49   : > { %s867_s23 = scalar_lea.vmem %s1210_s6, 1024  ;;  %s1047_s13 = smov [#allocation2]  }
  0x4a   : > { %p868_p6 = scmp.ne.s32.totalorder %s1210_s6, %s867_s23  ;;  %s872_s14 = sshll.u32 %s1047_s13, 4  ;;  %s873_s14 = int_to_ptr.vmem [resolvable:$false] %s872_s14 }
  0x4b   : > { %s874_s1 = scalar_lea.vmem %s873_s14, 2048  ;;  %p875_p0 = scmp.lt.s32.totalorder %s1210_s6, %s873_s14 }
  0x4c   : > { %p870_p9 = pnand %p868_p6, %p1169_p2  ;;  %p876_p11 = scmp.lt.s32.totalorder %s874_s1, %s867_s23 }
  0x4e   : > { %p871_p12 = pneg %p870_p9  ;;  %p877_p8 = por %p876_p11, %p875_p0 }
  0x50   : > { %p878_p10 = pnand %p877_p8, %p871_p12 }
  0x52   : > { %881 = shalt.err (!%p878_p10)
}
  0x53   : > { %s1526_s27 = smov 8   ;;  %s1527_s17 = smov 128  }
  0x54   : > { %767 = dma.hbm_to_vmem [thread:$0]  (!%p1148_p13), %s1201_s26, 1024, %s1210_s6, %s1214_s15, %s1527_s17, %s1527_s17, %s1526_s27  }
  0x55   : > { %s1245_s13 = scalar_lea.hbm %s1501_s2, %s1142_s7  ;;  %s248_s23 = scalar_lea.vmem [#allocation7], %s1146_s8 }
  0x56   : > { %s255_s14 = sshll.u32 %s248_s23, 4  ;;  %s882_s1 = scalar_lea.hbm %s1245_s13, 1024  ;;  %s1248_s14 = int_to_ptr.vmem [resolvable:$true] %s255_s14 }
  0x57   : > { %p883_p11 = scmp.ne.s32.totalorder %s1245_s13, %s882_s1  ;;  %s887_s26 = scalar_lea.hbm %s1501_s2, 2048 }
  0x58   : > { %p888_p3 = scmp.lt.u32.totalorder %s1245_s13, %s1501_s2  ;;  %p889_p5 = scmp.lt.u32.totalorder %s887_s26, %s882_s1 }
  0x59   : > { %p885_p4 = pnand %p883_p11, %p1169_p2  ;;  %p891_p6 = scmp.lt.u32.totalorder %s882_s1, %s1245_s13 }
  0x5a   : > { %p890_p7 = por %p889_p5, %p888_p3 }
  0x5b   : > { %p886_p1 = pneg %p885_p4 }
  0x5c   : > { %p892_p9 = por %p891_p6, %p890_p7 }
  0x5e   : > { %p893_p12 = pnand %p892_p9, %p886_p1 }
  0x60   : > { %896 = shalt.err (!%p893_p12)
}
  0x61   : > { %s897_s8 = scalar_lea.vmem %s1248_s14, 1024  ;;  %s1048_s0 = smov [#allocation7]  }
  0x62   : > { %p898_p0 = scmp.ne.s32.totalorder %s1248_s14, %s897_s8  ;;  %s902_s12 = sshll.u32 %s1048_s0, 4  ;;  %s903_s12 = int_to_ptr.vmem [resolvable:$false] %s902_s12 }
  0x63   : > { %s904_s10 = scalar_lea.vmem %s903_s12, 2048  ;;  %p905_p11 = scmp.lt.s32.totalorder %s1248_s14, %s903_s12 }
  0x64   : > { %p900_p8 = pnand %p898_p0, %p1169_p2  ;;  %p906_p4 = scmp.lt.s32.totalorder %s904_s10, %s897_s8 }
  0x66   : > { %p901_p10 = pneg %p900_p8  ;;  %p907_p3 = por %p906_p4, %p905_p11 }
  0x68   : > { %p908_p5 = pnand %p907_p3, %p901_p10 }
  0x6a   : > { %911 = shalt.err (!%p908_p5)
}
  0x6b   : > { %773 = dma.hbm_to_vmem [thread:$0]  (!%p1148_p13), %s1245_s13, 1024, %s1248_s14, %s1163_s16, %s1527_s17, %s1527_s17, %s1526_s27  }
  0x6c   : > { %p1528_p2 = scmp.ne.s32.totalorder %s1524_s11, 0 }
  0x6d   : > { %s1278_s25 = sand.u32 (!%p1528_p2), 1, %s1034_s19   ;;  %p1529_p1 = scmp.ne.s32.totalorder (!%p1528_p2), %s1516_s28, 0 }
  0x6e   : > { %267 = sbr.rel (%p1528_p2) target bundleno = 211 (0xd3), region = 32  ;;  %s1281_s23 = sshll.u32 (!%p1528_p2), %s1278_s25, 6 }
  0x6f   : > { %s270_s9 = scalar_lea.sflag (!%p1528_p2), [#allocation3], %s1278_s25  ;;  %s1285_s1 = scalar_lea.vmem (!%p1528_p2), [#allocation2], %s1281_s23 }
  0x75   : > { %1013 = dma.done.wait (%p1529_p1), %s270_s9, 1024  }
  0x76   : > { %1015 = vsyncadd (%p1529_p1), %s270_s9, 4294966272  ;;  %s278_s16 = sand.u32 1, %s1105_s22   ;;  %s282_s27 = scalar_lea.vmem [#allocation5], %s1281_s23 }
  0x77   : > { %s279_s11 = scalar_lea.sflag [#allocation6], %s278_s16 }
  0x78   : > { %1017 = dma.done.wait (%p1529_p1), %s279_s11, 2048  }
  0x79   : > { %1019 = vsyncadd (%p1529_p1), %s279_s11, 4294965248  ;;  %v387_v0 = vld [vmem:[%s282_s27] sm:$0xff]  ;;  %v388_v1 = vld [vmem:[%s282_s27 + $0x8] sm:$0xff]  ;;  %vm378_vm0 = vcmask 130048   ;;  %s1300_s28 = scalar_lea.vmem [#allocation9], %s1281_s23  ;;  %s1304_s13 = sshll.u32 %s1105_s22, 10 }
  0x7a   : > { %v389_v2 = vld [vmem:[%s282_s27 + $0x10] sm:$0xff]  ;;  %v395_v3 = vmul.f32 0.5, %v387_v0  ;;  %v396_v4 = vmul.f32 0.5, %v388_v1  ;;  %v390_v6 = vld [vmem:[%s282_s27 + $0x18] sm:$0xff]  ;;  %v391_v7 = vld [vmem:[%s282_s27 + $0x20] sm:$0xff]  ;;  %s523_s17 = sshll.u32 %s1300_s28, 4  ;;  %s1334_s26 = scalar_lea.hbm %s1503_s4, %s1304_s13  ;;  %s1317_s17 = int_to_ptr.vmem [resolvable:$true] %s523_s17 }
  0x7b   : > { %v397_v5 = vmul.f32 0.5, %v389_v2  ;;  %v392_v8 = vld [vmem:[%s282_s27 + $0x28] sm:$0xff]  ;;  %v398_v9 = vmul.f32 0.5, %v390_v6  ;;  %v399_v10 = vmul.f32 0.5, %v391_v7  ;;  %v393_v12 = vld [vmem:[%s282_s27 + $0x30] sm:$0xff]  ;;  %v394_v13 = vld [vmem:[%s282_s27 + $0x38] sm:$0xff] }
  0x7c   : > { %v400_v11 = vmul.f32 0.5, %v392_v8  ;;  %v403_v14 = vadd.f32 0.5, %v395_v3  ;;  %v404_v15 = vadd.f32 0.5, %v396_v4  ;;  %v401_v17 = vmul.f32 0.5, %v393_v12  ;;  %v338_v26 = vld [vmem:[%s1285_s1] sm:$0xff]  ;;  %v339_v27 = vld [vmem:[%s1285_s1 + $0x8] sm:$0xff] }
  0x7d   : > { %v405_v16 = vadd.f32 0.5, %v397_v5  ;;  %v406_v18 = vadd.f32 0.5, %v398_v9  ;;  %v407_v19 = vadd.f32 0.5, %v399_v10  ;;  %v402_v21 = vmul.f32 0.5, %v394_v13  ;;  %v340_v32 = vld [vmem:[%s1285_s1 + $0x10] sm:$0xff]  ;;  %v341_v33 = vld [vmem:[%s1285_s1 + $0x18] sm:$0xff] }
  0x7e   : > { %v408_v20 = vadd.f32 0.5, %v400_v11  ;;  %v411_v22 = vmax.f32 %v403_v14, 0.0  ;;  %v412_v23 = vmax.f32 %v404_v15, 0.0  ;;  %v409_v25 = vadd.f32 0.5, %v401_v17  ;;  %v342_v38 = vld [vmem:[%s1285_s1 + $0x20] sm:$0xff]  ;;  %v343_v39 = vld [vmem:[%s1285_s1 + $0x28] sm:$0xff] }
  0x7f   : > { %v413_v24 = vmax.f32 %v405_v16, 0.0  ;;  %v414_v28 = vmax.f32 %v406_v18, 0.0  ;;  %v415_v29 = vmax.f32 %v407_v19, 0.0  ;;  %v410_v31 = vadd.f32 0.5, %v402_v21  ;;  %v344_v44 = vld [vmem:[%s1285_s1 + $0x30] sm:$0xff]  ;;  %v345_v49 = vld [vmem:[%s1285_s1 + $0x38] sm:$0xff] }
  0x80   : > { %v416_v30 = vmax.f32 %v408_v20, 0.0  ;;  %v419_v34 = vmin.f32 %v411_v22, 1.0  ;;  %v420_v35 = vmin.f32 %v412_v23, 1.0  ;;  %v417_v37 = vmax.f32 %v409_v25, 0.0  ;;  %s1339_s15 = scalar_lea.vmem [#allocation8], %s1281_s23  ;;  %s1345_s8 = scalar_lea.vmem [#allocation7], %s1281_s23 }
  0x81   : > { %v421_v36 = vmin.f32 %v413_v24, 1.0  ;;  %v422_v40 = vmin.f32 %v414_v28, 1.0  ;;  %v423_v41 = vmin.f32 %v415_v29, 1.0  ;;  %v418_v43 = vmax.f32 %v410_v31, 0.0  ;;  %s507_s7 = sshll.u32 %s1339_s15, 4  ;;  %v435_v62 = vld [vmem:[%s1345_s8] sm:$0xff]  ;;  %s1387_s7 = int_to_ptr.vmem [resolvable:$true] %s507_s7 }
  0x82   : > { %v424_v42 = vmin.f32 %v416_v30, 1.0  ;;  %427 = vst.msk [vmem:[%s1300_s28] sm:$0xff] %vm378_vm0, %v419_v34  ;;  %428 = vst.msk [vmem:[%s1300_s28 + $0x8] sm:$0xff] %vm378_vm0, %v420_v35  ;;  %v425_v45 = vmin.f32 %v417_v37, 1.0  ;;  %v346_v46 = vmul.f32 0.5, %v338_v26  ;;  %v347_v47 = vmul.f32 0.5, %v339_v27 }
  0x83   : > { %429 = vst.msk [vmem:[%s1300_s28 + $0x10] sm:$0xff] %vm378_vm0, %v421_v36  ;;  %v348_v48 = vmul.f32 0.5, %v340_v32  ;;  %430 = vst.msk [vmem:[%s1300_s28 + $0x18] sm:$0xff] %vm378_vm0, %v422_v40  ;;  %v426_v50 = vmin.f32 %v418_v43, 1.0  ;;  %v349_v51 = vmul.f32 0.5, %v341_v33  ;;  %v350_v52 = vmul.f32 0.5, %v342_v38 }
  0x84   : > { %431 = vst.msk [vmem:[%s1300_s28 + $0x20] sm:$0xff] %vm378_vm0, %v423_v41  ;;  %432 = vst.msk [vmem:[%s1300_s28 + $0x28] sm:$0xff] %vm378_vm0, %v424_v42  ;;  %v351_v53 = vmul.f32 0.5, %v343_v39  ;;  %v354_v54 = vadd.f32 0.5, %v346_v46  ;;  %v355_v55 = vadd.f32 0.5, %v347_v47  ;;  %v352_v57 = vmul.f32 0.5, %v344_v44 }
  0x85   : > { %433 = vst.msk [vmem:[%s1300_s28 + $0x30] sm:$0xff] %vm378_vm0, %v425_v45  ;;  %v356_v56 = vadd.f32 0.5, %v348_v48  ;;  %434 = vst.msk [vmem:[%s1300_s28 + $0x38] sm:$0xff] %vm378_vm0, %v426_v50  ;;  %v357_v58 = vadd.f32 0.5, %v349_v51  ;;  %v358_v59 = vadd.f32 0.5, %v350_v52  ;;  %v353_v61 = vmul.f32 0.5, %v345_v49 }
  0x86   : > { %v359_v60 = vadd.f32 0.5, %v351_v53  ;;  %v436_v63 = vld [vmem:[%s1345_s8 + $0x8] sm:$0xff]  ;;  %v362_v0 = vmax.f32 %v354_v54, 0.0  ;;  %v363_v1 = vmax.f32 %v355_v55, 0.0  ;;  %v360_v3 = vadd.f32 0.5, %v352_v57  ;;  %s1351_s0 = scalar_lea.sflag [#allocation10], %s278_s16 }
  0x87   : > { %v364_v2 = vmax.f32 %v356_v56, 0.0  ;;  %s912_s12 = scalar_lea.vmem %s1317_s17, 1024  ;;  %p1530_p7 = scmp.ne.s32.totalorder %s1517_s29, 0 }
  0x88   : > { %p913_p13 = scmp.ne.s32.totalorder %s1317_s17, %s912_s12  ;;  %s1049_s10 = smov [#allocation9]  }
  0x89   : > { %s916_s9 = sshll.u32 %s1049_s10, 4  ;;  %s917_s9 = int_to_ptr.vmem [resolvable:$false] %s916_s9 }
  0x8a   : > { %p914_p6 = pnand %p913_p13, %p1530_p7  ;;  %s918_s1 = scalar_lea.vmem %s917_s9, 2048 }
  0x8b   : > { %p919_p12 = scmp.lt.s32.totalorder %s1317_s17, %s917_s9  ;;  %p920_p0 = scmp.lt.s32.totalorder %s918_s1, %s912_s12 }
  0x8c   : > { %p915_p9 = pneg %p914_p6 }
  0x8d   : > { %p921_p8 = por %p920_p0, %p919_p12 }
  0x8f   : > { %p922_p10 = pnand %p921_p8, %p915_p9 }
  0x91   : > { %925 = shalt.err (!%p922_p10)
}
  0x92   : > { %s926_s22 = scalar_lea.hbm %s1334_s26, 1024  ;;  %s930_s27 = scalar_lea.hbm %s1503_s4, 2048 }
  0x93   : > { %p927_p11 = scmp.ne.s32.totalorder %s1334_s26, %s926_s22  ;;  %p931_p5 = scmp.lt.u32.totalorder %s1334_s26, %s1503_s4 }
  0x94   : > { %p932_p2 = scmp.lt.u32.totalorder %s930_s27, %s926_s22  ;;  %p934_p13 = scmp.lt.u32.totalorder %s926_s22, %s1334_s26 }
  0x95   : > { %p928_p4 = pnand %p927_p11, %p1530_p7 }
  0x96   : > { %p933_p1 = por %p932_p2, %p931_p5 }
  0x97   : > { %p929_p3 = pneg %p928_p4 }
  0x98   : > { %p935_p6 = por %p934_p13, %p933_p1 }
  0x9a   : > { %p936_p9 = pnand %p935_p6, %p929_p3 }
  0x9c   : > { %939 = shalt.err (!%p936_p9)
}
  0x9d   : > { %s1050_s6 = smov 128   ;;  %s1051_s12 = smov 8   ;;  %v365_v4 = vmax.f32 %v357_v58, 0.0  ;;  %v366_v5 = vmax.f32 %v358_v59, 0.0  ;;  %v367_v6 = vmax.f32 %v359_v60, 0.0  ;;  %v361_v7 = vadd.f32 0.5, %v353_v61 }
  0x9e   : > { %759 = dma.vmem_to_hbm [thread:$0]  (%p1530_p7), %s1317_s17, 1024, %s1334_s26, %s1351_s0, %s1050_s6, %s1050_s6, %s1051_s12   ;;  %v370_v10 = vmin.f32 %v362_v0, 1.0  ;;  %v371_v11 = vmin.f32 %v363_v1, 1.0  ;;  %v372_v12 = vmin.f32 %v364_v2, 1.0  ;;  %v368_v13 = vmax.f32 %v360_v3, 0.0 }
  0x9f   : > { %v437_v8 = vld [vmem:[%s1345_s8 + $0x10] sm:$0xff]  ;;  %v438_v9 = vld [vmem:[%s1345_s8 + $0x18] sm:$0xff]  ;;  %v439_v14 = vld [vmem:[%s1345_s8 + $0x20] sm:$0xff]  ;;  %v373_v16 = vmin.f32 %v365_v4, 1.0  ;;  %v374_v17 = vmin.f32 %v366_v5, 1.0  ;;  %v375_v18 = vmin.f32 %v367_v6, 1.0  ;;  %s1404_s10 = scalar_lea.hbm %s1502_s3, %s1304_s13 }
  0xa0   : > { %v440_v15 = vld [vmem:[%s1345_s8 + $0x28] sm:$0xff]  ;;  %v369_v19 = vmax.f32 %v361_v7, 0.0  ;;  %v441_v20 = vld [vmem:[%s1345_s8 + $0x30] sm:$0xff]  ;;  %379 = vst.msk [vmem:[%s1339_s15] sm:$0xff] %vm378_vm0, %v370_v10  ;;  %380 = vst.msk [vmem:[%s1339_s15 + $0x8] sm:$0xff] %vm378_vm0, %v371_v11  ;;  %v376_v21 = vmin.f32 %v368_v13, 1.0 }
  0xa1   : > { %381 = vst.msk [vmem:[%s1339_s15 + $0x10] sm:$0xff] %vm378_vm0, %v372_v12  ;;  %v443_v22 = vmul.f32 0.5, %v435_v62  ;;  %v444_v23 = vmul.f32 0.5, %v436_v63  ;;  %v445_v24 = vmul.f32 0.5, %v437_v8  ;;  %v442_v25 = vld [vmem:[%s1345_s8 + $0x38] sm:$0xff]  ;;  %382 = vst.msk [vmem:[%s1339_s15 + $0x18] sm:$0xff] %vm378_vm0, %v373_v16 }
  0xa2   : > { %383 = vst.msk [vmem:[%s1339_s15 + $0x20] sm:$0xff] %vm378_vm0, %v374_v17  ;;  %384 = vst.msk [vmem:[%s1339_s15 + $0x28] sm:$0xff] %vm378_vm0, %v375_v18  ;;  %v377_v26 = vmin.f32 %v369_v19, 1.0  ;;  %v446_v27 = vmul.f32 0.5, %v438_v9  ;;  %v447_v28 = vmul.f32 0.5, %v439_v14  ;;  %v448_v29 = vmul.f32 0.5, %v440_v15 }
  0xa3   : > { %385 = vst.msk [vmem:[%s1339_s15 + $0x30] sm:$0xff] %vm378_vm0, %v376_v21  ;;  %v451_v30 = vadd.f32 0.5, %v443_v22  ;;  %v452_v31 = vadd.f32 0.5, %v444_v23  ;;  %v453_v32 = vadd.f32 0.5, %v445_v24  ;;  %v449_v33 = vmul.f32 0.5, %v441_v20  ;;  %s484_s8 = scalar_lea.sflag [#allocation4], %s1278_s25 }
  0xa4   : > { %386 = vst.msk [vmem:[%s1339_s15 + $0x38] sm:$0xff] %vm378_vm0, %v377_v26  ;;  %v454_v34 = vadd.f32 0.5, %v446_v27  ;;  %v455_v35 = vadd.f32 0.5, %v447_v28  ;;  %v456_v36 = vadd.f32 0.5, %v448_v29  ;;  %v450_v37 = vmul.f32 0.5, %v442_v25  ;;  %s940_s9 = scalar_lea.vmem %s1387_s7, 1024 }
  0xa5   : > { %v459_v38 = vmax.f32 %v451_v30, 0.0  ;;  %v460_v39 = vmax.f32 %v452_v31, 0.0  ;;  %v461_v40 = vmax.f32 %v453_v32, 0.0  ;;  %v457_v41 = vadd.f32 0.5, %v449_v33  ;;  %p941_p12 = scmp.ne.s32.totalorder %s1387_s7, %s940_s9  ;;  %s1052_s1 = smov [#allocation8]  }
  0xa6   : > { %s944_s22 = sshll.u32 %s1052_s1, 4  ;;  %s945_s22 = int_to_ptr.vmem [resolvable:$false] %s944_s22 }
  0xa7   : > { %p942_p0 = pnand %p941_p12, %p1530_p7  ;;  %s946_s16 = scalar_lea.vmem %s945_s22, 2048 }
  0xa8   : > { %p947_p10 = scmp.lt.s32.totalorder %s1387_s7, %s945_s22  ;;  %p948_p11 = scmp.lt.s32.totalorder %s946_s16, %s940_s9 }
  0xa9   : > { %p943_p8 = pneg %p942_p0 }
  0xaa   : > { %p949_p4 = por %p948_p11, %p947_p10 }
  0xac   : > { %p950_p3 = pnand %p949_p4, %p943_p8 }
  0xae   : > { %953 = shalt.err (!%p950_p3)
}
  0xaf   : > { %s954_s15 = scalar_lea.hbm %s1404_s10, 1024  ;;  %s958_s28 = scalar_lea.hbm %s1502_s3, 2048 }
  0xb0   : > { %p955_p5 = scmp.ne.s32.totalorder %s1404_s10, %s954_s15  ;;  %p959_p13 = scmp.lt.u32.totalorder %s1404_s10, %s1502_s3 }
  0xb1   : > { %p960_p6 = scmp.lt.u32.totalorder %s958_s28, %s954_s15  ;;  %p962_p12 = scmp.lt.u32.totalorder %s954_s15, %s1404_s10 }
  0xb2   : > { %p956_p2 = pnand %p955_p5, %p1530_p7 }
  0xb3   : > { %p961_p9 = por %p960_p6, %p959_p13 }
  0xb4   : > { %p957_p1 = pneg %p956_p2 }
  0xb5   : > { %p963_p0 = por %p962_p12, %p961_p9 }
  0xb7   : > { %p964_p8 = pnand %p963_p0, %p957_p1 }
  0xb9   : > { %967 = shalt.err (!%p964_p8)
}
  0xba   : > { %758 = dma.vmem_to_hbm [thread:$0]  (%p1530_p7), %s1387_s7, 1024, %s1404_s10, %s484_s8, %s1050_s6, %s1050_s6, %s1051_s12   ;;  %v462_v42 = vmax.f32 %v454_v34, 0.0  ;;  %v463_v43 = vmax.f32 %v455_v35, 0.0  ;;  %v464_v44 = vmax.f32 %v456_v36, 0.0  ;;  %v458_v45 = vadd.f32 0.5, %v450_v37 }
  0xbb   : > { %v467_v46 = vmin.f32 %v459_v38, 1.0  ;;  %s337_s26 = scalar_lea.vmem [#allocation11], %s1281_s23  ;;  %v468_v47 = vmin.f32 %v460_v39, 1.0  ;;  %v469_v48 = vmin.f32 %v461_v40, 1.0  ;;  %v465_v49 = vmax.f32 %v457_v41, 0.0  ;;  %s1450_s7 = scalar_lea.hbm %s1504_s5, %s1304_s13 }
  0xbc   : > { %s539_s9 = sshll.u32 %s337_s26, 4  ;;  %v470_v50 = vmin.f32 %v462_v42, 1.0  ;;  %v471_v51 = vmin.f32 %v463_v43, 1.0  ;;  %v472_v52 = vmin.f32 %v464_v44, 1.0  ;;  %v466_v53 = vmax.f32 %v458_v45, 0.0  ;;  %s1053_s8 = smov [#allocation11]   ;;  %s1441_s9 = int_to_ptr.vmem [resolvable:$true] %s539_s9 }
  0xbd   : > { %475 = vst.msk [vmem:[%s337_s26] sm:$0xff] %vm378_vm0, %v467_v46  ;;  %476 = vst.msk [vmem:[%s337_s26 + $0x8] sm:$0xff] %vm378_vm0, %v468_v47  ;;  %v473_v54 = vmin.f32 %v465_v49, 1.0  ;;  %s968_s10 = scalar_lea.vmem %s1441_s9, 1024  ;;  %s972_s1 = sshll.u32 %s1053_s8, 4  ;;  %s973_s1 = int_to_ptr.vmem [resolvable:$false] %s972_s1 }
  0xbe   : > { %477 = vst.msk [vmem:[%s337_s26 + $0x10] sm:$0xff] %vm378_vm0, %v469_v48  ;;  %478 = vst.msk [vmem:[%s337_s26 + $0x18] sm:$0xff] %vm378_vm0, %v470_v50  ;;  %v474_v55 = vmin.f32 %v466_v53, 1.0  ;;  %p969_p10 = scmp.ne.s32.totalorder %s1441_s9, %s968_s10  ;;  %s974_s22 = scalar_lea.vmem %s973_s1, 2048 }
  0xbf   : > { %479 = vst.msk [vmem:[%s337_s26 + $0x20] sm:$0xff] %vm378_vm0, %v471_v51  ;;  %480 = vst.msk [vmem:[%s337_s26 + $0x28] sm:$0xff] %vm378_vm0, %v472_v52  ;;  %p975_p3 = scmp.lt.s32.totalorder %s1441_s9, %s973_s1  ;;  %p976_p5 = scmp.lt.s32.totalorder %s974_s22, %s968_s10 }
  0xc0   : > { %481 = vst.msk [vmem:[%s337_s26 + $0x30] sm:$0xff] %vm378_vm0, %v473_v54  ;;  %482 = vst.msk [vmem:[%s337_s26 + $0x38] sm:$0xff] %vm378_vm0, %v474_v55  ;;  %p970_p11 = pnand %p969_p10, %p1530_p7 }
  0xc1   : > { %p977_p2 = por %p976_p5, %p975_p3 }
  0xc2   : > { %p971_p4 = pneg %p970_p11 }
  0xc4   : > { %p978_p1 = pnand %p977_p2, %p971_p4 }
  0xc6   : > { %981 = shalt.err (!%p978_p1)
}
  0xc7   : > { %s982_s13 = scalar_lea.hbm %s1450_s7, 1024  ;;  %s986_s11 = scalar_lea.hbm %s1504_s5, 2048 }
  0xc8   : > { %p983_p13 = scmp.ne.s32.totalorder %s1450_s7, %s982_s13  ;;  %p987_p12 = scmp.lt.u32.totalorder %s1450_s7, %s1504_s5 }
  0xc9   : > { %p988_p0 = scmp.lt.u32.totalorder %s986_s11, %s982_s13  ;;  %p990_p10 = scmp.lt.u32.totalorder %s982_s13, %s1450_s7 }
  0xca   : > { %p984_p6 = pnand %p983_p13, %p1530_p7 }
  0xcb   : > { %p989_p8 = por %p988_p0, %p987_p12 }
  0xcc   : > { %p985_p9 = pneg %p984_p6 }
  0xcd   : > { %p991_p11 = por %p990_p10, %p989_p8 }
  0xcf   : > { %p992_p4 = pnand %p991_p11, %p985_p9 }
  0xd1   : > { %995 = shalt.err (!%p992_p4)
}
  0xd2   : > { %760 = dma.vmem_to_hbm [thread:$0]  (%p1530_p7), %s1441_s9, 1024, %s1450_s7, %s1351_s0, %s1050_s6, %s1050_s6, %s1051_s12  }
  0xd3 PF: > { %s554_s14 = sand.u32 1, %s1030_s18   ;;  %p1531_p3 = scmp.ne.s32.totalorder %s1518_s30, 0 }
  0xd4   : > { %p1532_p5 = scmp.ge.s32.totalorder %s1042_s21, 2  ;;  %s555_s17 = scalar_lea.sflag [#allocation4], %s554_s14 }
  0xd6   : > { %p775_p2 = pnand %p1532_p5, %p1531_p3 }
  0xd8   : > { %1021 = dma.done.wait (!%p775_p2), %s555_s17, 1024  }
  0xd9   : > { %1023 = vsyncadd (!%p775_p2), %s555_s17, 4294966272  ;;  %s1533_s29 = sadd.s32 4294967294, %s1042_s21  }
  0xda   : > { %s563_s26 = sand.u32 1, %s1533_s29  }
  0xdb   : > { %s564_s25 = scalar_lea.sflag [#allocation10], %s563_s26 }
  0xdc   : > { %1025 = dma.done.wait (!%p775_p2), %s564_s25, 2048  }
  0xdd   : > { %1027 = vsyncadd (!%p775_p2), %s564_s25, 4294965248  ;;  %s1534_s0 = sld [smem:[#allocation16_spill]]  ;;  %p25_p7 = scmp.ge.s32.totalorder %s1109_s24, 4  }
  0xde   : > { %s1535_s18 = smov %s1034_s19  ;;  %s1536_s19 = smov %s1038_s20 }
  0xdf   : > { %s1538_s21 = smov %s1109_s24  ;;  %27 = sbr.rel (!%p25_p7) target bundleno = 12 (0xc), region = 133 }
  0xe3   : > { %s1537_s20 = smov %s1534_s0 }
  0xe6   :  { %578 = vsyncpa [#allocation3], 1 }
  0xe7   :  { %580 = vsyncpa [#allocation3 + $0x1], 1 }
  0xe8   :  { %581 = vsyncpa [#allocation6], 1 }
  0xe9   :  { %583 = vsyncpa [#allocation6 + $0x1], 1 }
  0xea   :  { %584 = vsyncpa [#allocation4], 1 }
  0xeb   :  { %586 = vsyncpa [#allocation4 + $0x1], 1 }
  0xec   :  { %587 = vsyncpa [#allocation10], 1 }
  0xed   :  { %589 = vsyncpa [#allocation10 + $0x1], 1 }

</bundles_post_ra>
